<compile_context>
chip_gen: v7x
topology: tpu7x:2x2x1
jax: 0.10.0
libtpu: 0.0.40
codegen_flags: <defaults>
</compile_context>

<pallas_src>
import jax
import jax.numpy as jnp
from jax import lax
from jax.experimental import pallas as pl
from jax.experimental.pallas import tpu as pltpu

LANE = 128
SUB = 8
CHUNK_ROWS = 256              # rows folded per fori_loop iteration in-kernel
TILE_BYTES_TARGET = 4 << 20   # ~4 MiB per input tile (8192 f32 rows / 16384 bf16 rows)
DELTA = 0.01


def _partial_sumsq_kernel(t1_ref, t2_ref, out_ref):
    """Sum of squared differences of one (TR, 128) tile, folded to (8, 128).

    Loops over CHUNK_ROWS-row slices so the f32 temporaries for the
    difference/square stay small (no multi-MiB VMEM round trip) and
    accumulates into a single (8,128) f32 value carried by the loop.
    The (chunk,128)->(chunk//8,8,128) reshape is tile-boundary aligned
    (layout free) and the axis-0 sum is pure VPU adds — no cross-lane XLU
    reduce and no lane-sparse store in the hot loop.
    """
    tm = t1_ref.shape[0]
    chunk = min(CHUNK_ROWS, tm)       # wrapper guarantees tm % chunk == 0
    nchunk = tm // chunk

    def body(c, acc):
        r0 = pl.multiple_of(c * chunk, chunk)
        a = t1_ref[pl.ds(r0, chunk), :].astype(jnp.float32)
        b = t2_ref[pl.ds(r0, chunk), :].astype(jnp.float32)
        d = a - b
        return acc + jnp.sum((d * d).reshape(chunk // SUB, SUB, LANE), axis=0)

    out_ref[0] = lax.fori_loop(0, nchunk, body,
                               jnp.zeros((SUB, LANE), jnp.float32))


def _round_down(x, m):
    return (x // m) * m


def hybnet_loss(t1, t2, params, thick_min, thick_max, theta_min, theta_max,
                beta_range, *, small_n_threshold=65536):
    """Forward-equivalent of the PyTorch HybnetLoss module.

    params is a (thickness, theta) pair, mirroring params[0] / params[1].
    """
    if t1.shape != t2.shape:
        raise ValueError(f"t1/t2 shape mismatch: {t1.shape} vs {t2.shape}")
    thick, theta = params
    n = t1.size

    t1_flat = t1.reshape(-1)          # contiguous row-major reshape: zero copy
    t2_flat = t2.reshape(-1)

    itemsizes = (t1.dtype.itemsize, t2.dtype.itemsize)
    row_align = max(8, 32 // min(itemsizes))   # sublane packing of narrowest dtype
    rows = n // LANE

    # The Pallas streaming path needs a lane-dense (rows,128) view, which is a
    # zero-copy reshape only when 128 | n.  Ragged sizes and tiny inputs go
    # through a single fused XLA pass instead of paying a full padded HBM copy
    # (which would ~triple traffic for a purely bandwidth-bound reduce).
    use_pallas = (n >= small_n_threshold and n % LANE == 0 and rows >= row_align)

    if use_pallas:
        # ---- tile selection --------------------------------------------------
        align = CHUNK_ROWS if rows >= CHUNK_ROWS else row_align
        tr_max = max(align, TILE_BYTES_TARGET // (LANE * max(itemsizes)))
        nb = -(-rows // tr_max)                     # cdiv: min #blocks at max tile
        if nb == 1 and rows >= 2 * align:
            nb = 2                                  # >= 2 blocks: v7x megacore split
        elif nb > 1 and nb % 2 == 1:
            nb += 1                                 # even block count for 2 TCs
        tr = max(align, min(tr_max, _round_down(rows // nb, align)))
        nb = rows // tr                             # full, in-bounds blocks only
        bulk_rows = nb * tr
        bulk = bulk_rows * LANE

        x1 = t1_flat.reshape(rows, LANE)            # zero-copy views
        x2 = t2_flat.reshape(rows, LANE)

        tile_bytes = tr * LANE * (itemsizes[0] + itemsizes[1])
        vmem_limit = int(min(48 << 20, max(16 << 20, 2 * tile_bytes + (8 << 20))))
        cost = pl.CostEstimate(
            flops=3 * bulk,
            transcendentals=0,
            bytes_accessed=bulk * (itemsizes[0] + itemsizes[1]) + nb * SUB * LANE * 4)

        partials = pl.pallas_call(
            _partial_sumsq_kernel,
            out_shape=jax.ShapeDtypeStruct((nb, SUB, LANE), jnp.float32),
            grid_spec=pltpu.PrefetchScalarGridSpec(
                num_scalar_prefetch=0,
                grid=(nb,),
                in_specs=[
                    # NOTE: if profiles show exposed DMA at block boundaries,
                    # add pipeline_mode=pl.Buffered(3) here (after tile bump).
                    pl.BlockSpec((tr, LANE), lambda i: (i, 0)),   # t1 tile
                    pl.BlockSpec((tr, LANE), lambda i: (i, 0)),   # t2 tile
                ],
                out_specs=pl.BlockSpec((1, SUB, LANE), lambda i: (i, 0, 0)),
            ),
            compiler_params=pltpu.CompilerParams(
                dimension_semantics=("parallel",),      # megacore-shardable on v7x
                vmem_limit_bytes=vmem_limit),
            cost_estimate=cost,
        )(x1, x2)

        sumsq = jnp.sum(partials)
        if bulk < n:
            # Sub-tile row remainder (< tr rows): tiny tail slice, plain JAX.
            dt = (t1_flat[bulk:].astype(jnp.float32)
                  - t2_flat[bulk:].astype(jnp.float32))
            sumsq = sumsq + jnp.sum(dt * dt)
        match_loss = sumsq / jnp.float32(n)
    else:
        # Small or lane-ragged input: one fused XLA pass is already ~roofline.
        d = t1_flat.astype(jnp.float32) - t2_flat.astype(jnp.float32)
        match_loss = jnp.mean(d * d)

    # ---- thick/theta range penalties: tiny arrays, plain-JAX epilogue -------
    thick = thick.astype(jnp.float32)
    theta = theta.astype(jnp.float32)
    d = DELTA
    thick_loss = jnp.maximum((thick - thick_min - d) / -d, (thick - thick_max + d) / d)
    range_thick = jnp.mean(jnp.maximum(thick_loss, 0.0))
    theta_loss = jnp.maximum((theta - theta_min - d) / -d, (theta - theta_max + d) / d)
    range_theta = jnp.mean(jnp.maximum(theta_loss, 0.0))

    return match_loss + beta_range * (range_theta + range_thick)


def hybnet_loss_ref(t1, t2, params, thick_min, thick_max, theta_min, theta_max,
                    beta_range):
    thick, theta = params
    match_loss = jnp.mean(jnp.square(t1.astype(jnp.float32) - t2.astype(jnp.float32)))
    d = DELTA
    thick_loss = jnp.maximum((thick - thick_min - d) / -d, (thick - thick_max + d) / d)
    range_thick = jnp.mean(jnp.maximum(thick_loss, 0.0))
    theta_loss = jnp.maximum((theta - theta_min - d) / -d, (theta - theta_max + d) / d)
    range_theta = jnp.mean(jnp.maximum(theta_loss, 0.0))
    return match_loss + beta_range * (range_theta + range_thick)


if __name__ == "__main__":
    key = jax.random.PRNGKey(0)
    k1, k2, k3, k4, k5, k6 = jax.random.split(key, 6)

    thick_min, thick_max = 0.05, 0.25
    theta_min, theta_max = 0.0, 1.0
    beta_range = 0.5

    # Design params consistent with the module: thickness (num_filters=4,
    # num_layers=8), theta (num_filters=4,).
    thick = jax.random.uniform(k3, (4, 8), dtype=jnp.float32, minval=0.0, maxval=0.3)
    theta = jax.random.uniform(k4, (4,), dtype=jnp.float32, minval=-0.2, maxval=1.2)

    def run(a, b, threshold):
        fn = jax.jit(lambda a_, b_, th_, te_: hybnet_loss(
            a_, b_, (th_, te_), thick_min, thick_max, theta_min, theta_max,
            beta_range, small_n_threshold=threshold))
        return fn(a, b, thick, theta)

    # 1) Small module-consistent spectra (batch=2, channels=4, 16x16); force the
    #    Pallas path so the kernel is exercised on the demo size.
    t1 = jax.random.normal(k1, (2, 4, 16, 16), dtype=jnp.float32)
    t2 = jax.random.normal(k2, (2, 4, 16, 16), dtype=jnp.float32)
    loss = run(t1, t2, 0)
    jax.block_until_ready(loss)
    ref = hybnet_loss_ref(t1, t2, (thick, theta), thick_min, thick_max,
                          theta_min, theta_max, beta_range)
    assert jnp.allclose(loss, ref, rtol=1e-4, atol=1e-5), (loss, ref)

    # 2) Default dispatch path: two parallel Pallas blocks plus a sub-tile
    #    row tail handled by the plain-JAX epilogue (no padded copy anywhere).
    a = jax.random.normal(k5, (1, 1027, 128), dtype=jnp.float32)
    b = jax.random.normal(k6, (1, 1027, 128), dtype=jnp.float32)
    loss2 = run(a, b, 65536)
    jax.block_until_ready(loss2)
    ref2 = hybnet_loss_ref(a, b, (thick, theta), thick_min, thick_max,
                           theta_min, theta_max, beta_range)
    assert jnp.allclose(loss2, ref2, rtol=1e-4, atol=1e-5), (loss2, ref2)

    print("KERNEL_OK")
</pallas_src>

<mosaic_0001>
module attributes {stable_mosaic.version = 11 : i64} {
  func.func @_partial_sumsq_kernel(%arg0: i32, %arg1: memref<8x128xf32, #tpu.memory_space<vmem>>, %arg2: memref<8x128xf32, #tpu.memory_space<vmem>>, %arg3: memref<1x8x128xf32, #tpu.memory_space<vmem>>) attributes {dimension_semantics = [#tpu.dimension_semantics<parallel>], iteration_bounds = array<i64: 2>, scalar_prefetch = 0 : i64, scratch_operands = 0 : i64, tpu.core_type = #tpu.core_type<tc>, window_params = [{transform_indices = @transform_0, window_bounds = array<i64: 8, 128>}, {transform_indices = @transform_1, window_bounds = array<i64: 8, 128>}, {transform_indices = @transform_2, window_bounds = array<i64: 1, 8, 128>}]} {
    %cst = arith.constant 0.000000e+00 : f32
    %0 = vector.broadcast %cst : f32 to vector<8x128xf32>
    %c0_i32 = arith.constant 0 : i32
    %c8_i32 = arith.constant 8 : i32
    %1 = arith.muli %c0_i32, %c8_i32 : i32
    %2 = tpu.assume_multiple %1, 8 : i32
    %3 = arith.index_cast %2 : i32 to index
    %c0 = arith.constant 0 : index
    %4 = vector.load %arg1[%3, %c0] : memref<8x128xf32, #tpu.memory_space<vmem>>, vector<8x128xf32>
    %5 = arith.index_cast %2 : i32 to index
    %c0_0 = arith.constant 0 : index
    %6 = vector.load %arg2[%5, %c0_0] : memref<8x128xf32, #tpu.memory_space<vmem>>, vector<8x128xf32>
    %7 = arith.subf %4, %6 : vector<8x128xf32>
    %8 = arith.mulf %7, %7 : vector<8x128xf32>
    %9 = vector.shape_cast %8 : vector<8x128xf32> to vector<1x8x128xf32>
    %cst_1 = arith.constant dense<0.000000e+00> : vector<8x128xf32>
    %10 = vector.multi_reduction <add>, %9, %cst_1 [0] : vector<1x8x128xf32> to vector<8x128xf32>
    %11 = arith.addf %0, %10 : vector<8x128xf32>
    %c1_i32 = arith.constant 1 : i32
    %c0_2 = arith.constant 0 : index
    %c0_3 = arith.constant 0 : index
    %c0_4 = arith.constant 0 : index
    %12 = vector.load %arg3[%c0_2, %c0_3, %c0_4] : memref<1x8x128xf32, #tpu.memory_space<vmem>>, vector<1x8x128xf32>
    %13 = vector.shape_cast %12 : vector<1x8x128xf32> to vector<8x128xf32>
    %14 = vector.shape_cast %11 : vector<8x128xf32> to vector<1x8x128xf32>
    tpu.vector_store %arg3[%c0_2, %c0_3, %c0_4], %14 {strides = array<i32>} : memref<1x8x128xf32, #tpu.memory_space<vmem>>, vector<1x8x128xf32>,
    return
  }
  func.func @transform_0(%arg0: i32) -> (i32, i32) {
    %c0_i32 = arith.constant 0 : i32
    %c0_i32_0 = arith.constant 0 : i32
    return %arg0, %c0_i32 : i32, i32
  }
  func.func @transform_1(%arg0: i32) -> (i32, i32) {
    %c0_i32 = arith.constant 0 : i32
    %c0_i32_0 = arith.constant 0 : i32
    return %arg0, %c0_i32 : i32, i32
  }
  func.func @transform_2(%arg0: i32) -> (i32, i32, i32) {
    %c0_i32 = arith.constant 0 : i32
    %c0_i32_0 = arith.constant 0 : i32
    %c0_i32_1 = arith.constant 0 : i32
    return %arg0, %c0_i32, %c0_i32_0 : i32, i32, i32
  }
}

</mosaic_0001>

<bundles_post_ra>
// kernel: _lambda_.1
= control target key start
LH: loop header
LB: loop body
LE: loop exit
PB: predicated region body
PF: predicated region fallthrough
CT: control target
= control target key end

     0   :  { %s250_s9 = smov 0   ;;  %s278_s0 = inlined_call_operand.vmem [shape: f32[16,128], index: 0, kind: input, shape index: {}]   ;;  %s279_s1 = inlined_call_operand.vmem [shape: f32[16,128], index: 1, kind: input, shape index: {}]   ;;  %s280_s2 = inlined_call_operand.vmem [shape: f32[2,8,128], index: 2, kind: output, shape index: {}]  }
   0x1 LB: > { %s228_s10 = sadd.s32 4294967295, %s252_s9   ;;  %p232_p0 = scmp.ge.s32.totalorder %s252_s9, 1  ;;  %s252_s9 = sphi %s250_s9, %s12_s9  }
   0x2   : > { %p120_p1 = scmp.lt.s32.totalorder %s252_s9, 3 }
   0x4   : > { %p121_p2 = pnand %p232_p0, %p120_p1 }
   0x5   : > { %p144_p3 = scmp.lt.s32.totalorder (!%p121_p2), %s228_s10, 1 }
   0x6   : > { %124 = sbr.rel (%p121_p2) target bundleno = 23 (0x17), region = 28 }
   0xd   : > { %s282_s10 = smov (!%p144_p3, %s228_s10), 1 }
   0xe   : > { %s233_s11 = sshll.u32 %s282_s10, 3 }
   0xf   : > { %s147_s14 = scalar_lea.vmem %s278_s0, %s233_s11  ;;  %s151_s17 = scalar_lea.vmem %s279_s1, %s233_s11 }
  0x10   : > { %v156_v0 = vld [vmem:[%s147_s14] sm:$0xff]  ;;  %s155_s20 = scalar_lea.vmem %s280_s2, %s233_s11 }
  0x11   : > { %v157_v1 = vld [vmem:[%s151_s17] sm:$0xff] }
  0x12   : > { %v158_v2 = vsub.f32 %v156_v0, %v157_v1 }
  0x14   : > { %v159_v3 = vmul.f32 %v158_v2, %v158_v2 }
  0x16   : > { %162 = vst [vmem:[%s155_s20] sm:$0xff] %v159_v3 }
  0x17 PF: > { %s12_s9 = sadd.s32 1, %s252_s9  }
  0x18   : > { %p9_p4 = scmp.ge.s32.totalorder %s12_s9, 4  }
  0x1a   :  { %11 = sbr.rel (!%p9_p4) target bundleno = 1 (0x1), region = 61 }

</bundles_post_ra>
